<compile_context>
chip_gen: v7x
topology: tpu7x:2x2x1
jax: 0.10.0
libtpu: 0.0.40
codegen_flags: <defaults>
</compile_context>

<pallas_src>
import functools

import jax
import jax.numpy as jnp
from jax.experimental import pallas as pl
from jax.experimental.pallas import tpu as pltpu


def _textcnn_fused_kernel(x_ref, w_ref, bias_ref, vlen_ref, dw_ref, db_ref,
                          out_ref, *, t_pad):
    # x_ref   : (B_TILE * T_pad, Kfeat)  im2col'd embedding windows (batch*time in M)
    # w_ref   : (Kfeat, Npad)            fused conv weight (all branches, all taps)
    # bias_ref: (1, Npad)                fused conv bias (f32)
    # vlen_ref: (1, Npad) int32          valid conv positions per output column
    # dw_ref  : (Npad, Opad)             lane-padded decoder weight
    # db_ref  : (1, Opad)                lane-padded decoder bias
    # out_ref : (B_TILE, Opad)
    m = x_ref.shape[0]
    n_pad = w_ref.shape[1]
    b_tile = m // t_pad

    # Single im2col matmul: all conv taps folded into K, batch*time folded into M.
    acc = jnp.dot(x_ref[...], w_ref[...],
                  preferred_element_type=jnp.float32)            # (m, Npad) f32

    # Bias (added once, hoisted) + ReLU, in f32.
    acc = jnp.maximum(acc + bias_ref[...], 0.0)

    # Reshape time back out (T_pad is a multiple of 8 -> pure sublane
    # re-interpretation) and zero the per-branch invalid tail positions with an
    # in-kernel iota mask (safe: ReLU output >= 0 before the max-pool).
    acc3 = acc.reshape(b_tile, t_pad, n_pad)
    t_idx = jax.lax.broadcasted_iota(jnp.int32, acc3.shape, 1)
    acc3 = jnp.where(t_idx < vlen_ref[...], acc3, 0.0)

    # Global max pooling over time -> (B_TILE, Npad) encoding, kept in VMEM.
    enc = jnp.max(acc3, axis=1)

    # Fused decoder Linear, lane-dense output.  (Dropout is identity at inference.)
    out_ref[...] = (jnp.dot(enc, dw_ref[...],
                            preferred_element_type=jnp.float32)
                    + db_ref[...]).astype(out_ref.dtype)


def textcnn_forward(params, inputs, *, b_tile=8, compute_dtype=None):
    # Embedding lookups (gather) are glue; kept in plain JAX/XLA.
    e1 = params["embedding"][inputs]              # (B, L, E)
    e2 = params["constant_embedding"][inputs]     # (B, L, E)
    B, L, E = e1.shape
    if compute_dtype is None:
        compute_dtype = e1.dtype                  # pass bf16 params on v6e/v7x

    convs = params["convs"]                       # list of (w=(k, 2E, c), b=(1, c))
    kernel_sizes = [int(w.shape[0]) for (w, _) in convs]
    channels = [int(w.shape[2]) for (w, _) in convs]
    k_max = max(kernel_sizes)
    k_min = min(kernel_sizes)
    assert L >= k_max, "sequence length must be >= the largest kernel size"

    T = L - k_min + 1                             # max number of conv positions
    t_pad = pl.cdiv(T, 8) * 8                     # sublane-aligned time tile
    kfeat = k_max * 2 * E                         # im2col contraction depth
    b_pad = pl.cdiv(B, b_tile) * b_tile

    n_total = sum(channels)
    n_out = params["decoder_w"].shape[1]
    n_pad = pl.cdiv(n_total, 128) * 128           # lane-dense fused Cout
    o_pad = pl.cdiv(n_out, 128) * 128             # lane-dense output width

    # --- XLA-side im2col (trace-time layout work; kernel is one big dot) ----
    emb = jnp.concatenate([e1, e2], axis=-1).astype(compute_dtype)   # (B, L, 2E)
    L_need = t_pad + k_max - 1
    emb = jnp.pad(emb, ((0, b_pad - B), (0, L_need - L), (0, 0)))
    x = jnp.concatenate([emb[:, j:j + t_pad, :] for j in range(k_max)],
                        axis=-1)                                     # (Bpad, Tpad, Kfeat)
    x = x.reshape(b_pad * t_pad, kfeat)

    # --- fused weights / bias / valid lengths (parameter re-layout; folds
    #     to constants under jit) --------------------------------------------
    w_fused = jnp.zeros((kfeat, n_pad), compute_dtype)
    bias = jnp.zeros((1, n_pad), jnp.float32)
    vlen = jnp.zeros((1, n_pad), jnp.int32)
    off = 0
    for (w, b), k, c in zip(convs, kernel_sizes, channels):
        w_fused = w_fused.at[:k * 2 * E, off:off + c].set(
            w.reshape(k * 2 * E, c).astype(compute_dtype))
        bias = bias.at[:, off:off + c].set(b.astype(jnp.float32))
        vlen = vlen.at[:, off:off + c].set(L - k + 1)
        off += c

    dec_w = jnp.zeros((n_pad, o_pad), jnp.float32)
    dec_w = dec_w.at[:n_total, :n_out].set(params["decoder_w"].astype(jnp.float32))
    dec_b = jnp.zeros((1, o_pad), jnp.float32)
    dec_b = dec_b.at[:, :n_out].set(params["decoder_b"].astype(jnp.float32))

    # TODO(synk): nn.Dropout(0.5) is identity at inference; train-mode dropout not modeled.
    out = pl.pallas_call(
        functools.partial(_textcnn_fused_kernel, t_pad=t_pad),
        out_shape=jax.ShapeDtypeStruct((b_pad, o_pad), jnp.float32),
        grid_spec=pltpu.PrefetchScalarGridSpec(
            num_scalar_prefetch=0,
            grid=(b_pad // b_tile,),
            in_specs=[
                pl.BlockSpec((b_tile * t_pad, kfeat), lambda i: (i, 0)),  # im2col LHS
                pl.BlockSpec((kfeat, n_pad), lambda i: (0, 0)),           # fused conv W
                pl.BlockSpec((1, n_pad), lambda i: (0, 0)),               # fused conv bias
                pl.BlockSpec((1, n_pad), lambda i: (0, 0)),               # valid lengths
                pl.BlockSpec((n_pad, o_pad), lambda i: (0, 0)),           # decoder W
                pl.BlockSpec((1, o_pad), lambda i: (0, 0)),               # decoder b
            ],
            out_specs=pl.BlockSpec((b_tile, o_pad), lambda i: (i, 0)),
        ),
        compiler_params=pltpu.CompilerParams(
            dimension_semantics=("parallel",)),
    )(x, w_fused, bias, vlen, dec_w, dec_b)
    return out[:B, :n_out]


def textcnn_reference(params, inputs):
    # Pure-JAX reference with PyTorch semantics (for the correctness check).
    e1 = params["embedding"][inputs]
    e2 = params["constant_embedding"][inputs]
    emb = jnp.concatenate([e1, e2], axis=-1)
    feats = []
    for (w, b) in params["convs"]:
        k = w.shape[0]
        L = emb.shape[1]
        outs = []
        for t in range(L - k + 1):
            acc = b
            for j in range(k):
                acc = acc + emb[:, t + j, :] @ w[j]
            outs.append(jnp.maximum(acc, 0.0))
        feats.append(jnp.max(jnp.stack(outs, axis=0), axis=0))
    encoding = jnp.concatenate(feats, axis=1)
    return encoding @ params["decoder_w"] + params["decoder_b"]


if __name__ == "__main__":
    key = jax.random.PRNGKey(0)
    vocab_size = 50
    embed_size = 16                     # conv in_channels = 2 * embed_size = 32
    kernel_sizes = (3, 4, 5)
    num_channels = (16, 16, 16)
    B, L = 16, 8                        # B=16, B_TILE=8 -> 2 grid steps (both v7x TCs)

    keys = jax.random.split(key, 16)
    emb_tbl = jax.random.normal(keys[0], (vocab_size, embed_size), jnp.float32) * 0.1
    const_tbl = jax.random.normal(keys[1], (vocab_size, embed_size), jnp.float32) * 0.1

    convs = []
    ki = 2
    for c, k in zip(num_channels, kernel_sizes):
        # PyTorch Conv1d weight has shape (c, 2E, k); re-layout to (k, 2E, c).
        w_pt = jax.random.normal(keys[ki], (c, 2 * embed_size, k), jnp.float32) * 0.1
        b = jax.random.normal(keys[ki + 1], (1, c), jnp.float32) * 0.1
        convs.append((jnp.transpose(w_pt, (2, 1, 0)), b))
        ki += 2

    # PyTorch Linear(sum(num_channels), 2): y = x @ W.T + b; store W.T directly.
    dec_w = jax.random.normal(keys[ki], (sum(num_channels), 2), jnp.float32) * 0.1
    dec_b = jax.random.normal(keys[ki + 1], (1, 2), jnp.float32) * 0.1

    params = {
        "embedding": emb_tbl,
        "constant_embedding": const_tbl,
        "convs": convs,
        "decoder_w": dec_w,
        "decoder_b": dec_b,
    }

    inputs = jax.random.randint(keys[-1], (B, L), 0, vocab_size, dtype=jnp.int32)

    # Demo runs in f32 for a tight tolerance; use compute_dtype=jnp.bfloat16
    # (or pass bf16 params/embeddings) on v6e/v7x for the native bf16 MXU path.
    out = jax.block_until_ready(textcnn_forward(params, inputs))
    ref = textcnn_reference(params, inputs)
    assert out.shape == (B, 2), out.shape
    assert jnp.allclose(out, ref, atol=1e-4, rtol=1e-4), (out, ref)
    print("KERNEL_OK")
</pallas_src>

<mosaic_0001>
module attributes {stable_mosaic.version = 11 : i64} {
  func.func @_textcnn_fused_kernel(%arg0: i32, %arg1: memref<64x160xf32, #tpu.memory_space<vmem>>, %arg2: memref<160x128xf32, #tpu.memory_space<vmem>>, %arg3: memref<1x128xf32, #tpu.memory_space<vmem>>, %arg4: memref<1x128xi32, #tpu.memory_space<vmem>>, %arg5: memref<128x128xf32, #tpu.memory_space<vmem>>, %arg6: memref<1x128xf32, #tpu.memory_space<vmem>>, %arg7: memref<8x128xf32, #tpu.memory_space<vmem>>) attributes {dimension_semantics = [#tpu.dimension_semantics<parallel>], iteration_bounds = array<i64: 2>, scalar_prefetch = 0 : i64, scratch_operands = 0 : i64, tpu.core_type = #tpu.core_type<tc>, window_params = [{transform_indices = @transform_0, window_bounds = array<i64: 64, 160>}, {pipeline_mode = #tpu.pipeline_mode<synchronous>, transform_indices = @transform_1, window_bounds = array<i64: 160, 128>}, {pipeline_mode = #tpu.pipeline_mode<synchronous>, transform_indices = @transform_2, window_bounds = array<i64: 1, 128>}, {pipeline_mode = #tpu.pipeline_mode<synchronous>, transform_indices = @transform_3, window_bounds = array<i64: 1, 128>}, {pipeline_mode = #tpu.pipeline_mode<synchronous>, transform_indices = @transform_4, window_bounds = array<i64: 128, 128>}, {pipeline_mode = #tpu.pipeline_mode<synchronous>, transform_indices = @transform_5, window_bounds = array<i64: 1, 128>}, {transform_indices = @transform_6, window_bounds = array<i64: 8, 128>}]} {
    %c0 = arith.constant 0 : index
    %c0_0 = arith.constant 0 : index
    %0 = vector.load %arg1[%c0, %c0_0] : memref<64x160xf32, #tpu.memory_space<vmem>>, vector<64x160xf32>
    %c0_1 = arith.constant 0 : index
    %c0_2 = arith.constant 0 : index
    %1 = vector.load %arg2[%c0_1, %c0_2] : memref<160x128xf32, #tpu.memory_space<vmem>>, vector<160x128xf32>
    %cst = arith.constant dense<0.000000e+00> : vector<64x128xf32>
    %2 = tpu.matmul %0, %1, %cst {dimension_numbers = #tpu.dot_dimension_numbers<[1], [0], [0], [1], [0, 0, 1, 1], [], []>} : vector<64x160xf32>, vector<160x128xf32>, vector<64x128xf32> -> vector<64x128xf32>
    %c0_3 = arith.constant 0 : index
    %c0_4 = arith.constant 0 : index
    %3 = vector.load %arg3[%c0_3, %c0_4] : memref<1x128xf32, #tpu.memory_space<vmem>>, vector<1x128xf32>
    %4 = vector.broadcast %3 : vector<1x128xf32> to vector<64x128xf32>
    %5 = arith.addf %2, %4 : vector<64x128xf32>
    %cst_5 = arith.constant 0.000000e+00 : f32
    %6 = vector.broadcast %cst_5 : f32 to vector<64x128xf32>
    %7 = arith.maximumf %5, %6 : vector<64x128xf32>
    %8 = vector.shape_cast %7 : vector<64x128xf32> to vector<8x8x128xf32>
    %9 = tpu.iota {dimensions = array<i32: 1>} : vector<8x8x128xi32>
    %c0_6 = arith.constant 0 : index
    %c0_7 = arith.constant 0 : index
    %10 = vector.load %arg4[%c0_6, %c0_7] : memref<1x128xi32, #tpu.memory_space<vmem>>, vector<1x128xi32>
    %11 = vector.shape_cast %10 : vector<1x128xi32> to vector<1x1x128xi32>
    %12 = vector.broadcast %11 : vector<1x1x128xi32> to vector<8x8x128xi32>
    %13 = arith.cmpi slt, %9, %12 : vector<8x8x128xi32>
    %cst_8 = arith.constant 0.000000e+00 : f32
    %14 = vector.broadcast %cst_8 : f32 to vector<8x8x128xf32>
    %15 = arith.select %13, %8, %14 : vector<8x8x128xi1>, vector<8x8x128xf32>
    %cst_9 = arith.constant dense<0xFF800000> : vector<8x128xf32>
    %16 = vector.multi_reduction <maximumf>, %15, %cst_9 [1] : vector<8x8x128xf32> to vector<8x128xf32>
    %c0_10 = arith.constant 0 : index
    %c0_11 = arith.constant 0 : index
    %17 = vector.load %arg5[%c0_10, %c0_11] : memref<128x128xf32, #tpu.memory_space<vmem>>, vector<128x128xf32>
    %cst_12 = arith.constant dense<0.000000e+00> : vector<8x128xf32>
    %18 = tpu.matmul %16, %17, %cst_12 {dimension_numbers = #tpu.dot_dimension_numbers<[1], [0], [0], [1], [0, 0, 1, 1], [], []>} : vector<8x128xf32>, vector<128x128xf32>, vector<8x128xf32> -> vector<8x128xf32>
    %c0_13 = arith.constant 0 : index
    %c0_14 = arith.constant 0 : index
    %19 = vector.load %arg6[%c0_13, %c0_14] : memref<1x128xf32, #tpu.memory_space<vmem>>, vector<1x128xf32>
    %20 = vector.broadcast %19 : vector<1x128xf32> to vector<8x128xf32>
    %21 = arith.addf %18, %20 : vector<8x128xf32>
    %c0_15 = arith.constant 0 : index
    %c0_16 = arith.constant 0 : index
    %22 = vector.load %arg7[%c0_15, %c0_16] : memref<8x128xf32, #tpu.memory_space<vmem>>, vector<8x128xf32>
    tpu.vector_store %arg7[%c0_15, %c0_16], %21 {strides = array<i32>} : memref<8x128xf32, #tpu.memory_space<vmem>>, vector<8x128xf32>,
    return
  }
  func.func @transform_0(%arg0: i32) -> (i32, i32) {
    %c0_i32 = arith.constant 0 : i32
    %c0_i32_0 = arith.constant 0 : i32
    return %arg0, %c0_i32 : i32, i32
  }
  func.func @transform_1(%arg0: i32) -> (i32, i32) {
    %c0_i32 = arith.constant 0 : i32
    %c0_i32_0 = arith.constant 0 : i32
    %c0_i32_1 = arith.constant 0 : i32
    return %c0_i32, %c0_i32_0 : i32, i32
  }
  func.func @transform_2(%arg0: i32) -> (i32, i32) {
    %c0_i32 = arith.constant 0 : i32
    %c0_i32_0 = arith.constant 0 : i32
    %c0_i32_1 = arith.constant 0 : i32
    return %c0_i32, %c0_i32_0 : i32, i32
  }
  func.func @transform_3(%arg0: i32) -> (i32, i32) {
    %c0_i32 = arith.constant 0 : i32
    %c0_i32_0 = arith.constant 0 : i32
    %c0_i32_1 = arith.constant 0 : i32
    return %c0_i32, %c0_i32_0 : i32, i32
  }
  func.func @transform_4(%arg0: i32) -> (i32, i32) {
    %c0_i32 = arith.constant 0 : i32
    %c0_i32_0 = arith.constant 0 : i32
    %c0_i32_1 = arith.constant 0 : i32
    return %c0_i32, %c0_i32_0 : i32, i32
  }
  func.func @transform_5(%arg0: i32) -> (i32, i32) {
    %c0_i32 = arith.constant 0 : i32
    %c0_i32_0 = arith.constant 0 : i32
    %c0_i32_1 = arith.constant 0 : i32
    return %c0_i32, %c0_i32_0 : i32, i32
  }
  func.func @transform_6(%arg0: i32) -> (i32, i32) {
    %c0_i32 = arith.constant 0 : i32
    %c0_i32_0 = arith.constant 0 : i32
    return %arg0, %c0_i32 : i32, i32
  }
}

</mosaic_0001>

<bundles_post_ra>
// kernel: tpu_custom_call.1
= control target key start
LH: loop header
LB: loop body
LE: loop exit
PB: predicated region body
PF: predicated region fallthrough
CT: control target
= control target key end

     0   :  { %11 = vsyncpa [#allocation3], 0  ;;  %s1255_s0 = inlined_call_operand.vmem [shape: f32[128,160], index: 0, kind: input, shape index: {}]   ;;  %s1256_s1 = inlined_call_operand.vmem [shape: f32[160,128], index: 1, kind: input, shape index: {}]   ;;  %s1257_s2 = inlined_call_operand.vmem [shape: f32[1,128], index: 2, kind: input, shape index: {}]   ;;  %s1258_s3 = inlined_call_operand.vmem [shape: s32[1,128], index: 3, kind: input, shape index: {}]   ;;  %s1259_s4 = inlined_call_operand.vmem [shape: f32[128,128], index: 4, kind: input, shape index: {}]   ;;  %s1260_s5 = inlined_call_operand.vmem [shape: f32[1,128], index: 5, kind: input, shape index: {}]   ;;  %s1261_s6 = inlined_call_operand.hbm [shape: f32[16,128], index: 6, kind: output, shape index: {}]  }
   0x1   :  { %13 = vsyncpa [#allocation3 + $0x1], 0  ;;  %s965_s21 = smov 0   ;;  %s967_s22 = smov 0  }
   0x2   :  { %s969_s23 = smov 0   ;;  %s971_s24 = smov 0  }
   0x3 LB: > { %s986_s25 = sadd.s32 4294967295, %s924_s24   ;;  %s690_s26 = sadd.s32 4294967294, %s924_s24   ;;  %s924_s24 = sphi %s971_s24, %s1269_s24   ;;  %s920_s23 = sphi %s969_s23, %s1268_s23   ;;  %s916_s22 = sphi %s967_s22, %s1267_s22   ;;  %s912_s21 = sphi %s965_s21, %s1266_s21  }
   0x4   : > { %s990_s27 = sadd.s32 1, %s924_s24   ;;  %s157_s28 = sadd.s32 1, %s920_s23 }
   0x5   : > { %s154_s29 = ssub.s32 %s924_s24, %s990_s27  ;;  %p167_p0 = scmp.ne.s32.totalorder %s920_s23, %s916_s22 }
   0x6   : > { %p155_p1 = scmp.eq.s32.totalorder %s154_s29, 0  ;;  %p168_p2 = scmp.eq.s32.totalorder %s986_s25, 1 }
   0x7   : > { %p173_p3 = scmp.ne.s32.totalorder %s916_s22, %s912_s21  ;;  %p174_p4 = scmp.eq.s32.totalorder %s690_s26, 1 }
   0x8   : > { %s1001_s30 = scalar_select %p155_p1, %s920_s23, %s157_s28  }
   0x9   : > { %p1003_p5 = por %p168_p2, %p167_p0  ;;  %p1007_p6 = por %p174_p4, %p173_p3 }
   0xa   : > { %p693_p7 = scmp.ge.s32.totalorder %s924_s24, 1  ;;  %p217_p8 = scmp.lt.s32.totalorder %s924_s24, 3 }
   0xc   : > { %p218_p9 = pnand %p693_p7, %p217_p8 }
   0xd   : > { %v271_v0 = vld [vmem:[%s1256_s1] sm:$0xff] (!%p218_p9)  ;;  %v272_v1 = vld [vmem:[%s1256_s1 + $0x8] sm:$0xff] (!%p218_p9)  ;;  %v273_v2 = vld [vmem:[%s1256_s1 + $0x10] sm:$0xff] (!%p218_p9)  ;;  %s695_s15 = sshll.u32 (!%p218_p9), %s986_s25, 3  ;;  %v926_v3 = vmov (!%p218_p9), 0.0|0.0   ;;  %vm298_vm0 = vcmask (!%p218_p9), 261120  }
   0xe   : > { %221 = sbr.rel (%p218_p9) target bundleno = 541 (0x21d), region = 44  ;;  %766 = vmatprep.subr.bf16.mxu0 (!%p218_p9), %v926_v3  ;;  %v767_v4 = vpack.c.bf16 (!%p218_p9), %v272_v1, %v271_v0  ;;  %v274_v5 = vld [vmem:[%s1256_s1 + $0x18] sm:$0xff] (!%p218_p9)  ;;  %p249_p10 = scmp.lt.s32.totalorder (!%p218_p9), %s695_s15, 15  ;;  %796 = vmatprep.subr.bf16.mxu1 (!%p218_p9), %v926_v3  ;;  %v275_v7 = vld [vmem:[%s1256_s1 + $0x20] sm:$0xff] (!%p218_p9)  ;;  %v276_v8 = vld [vmem:[%s1256_s1 + $0x28] sm:$0xff] (!%p218_p9)  ;;  %vm927_vm1 = vmmov (!%p218_p9), 0  }
   0xf   : > { %v770_v6 = vpack.c.bf16 (!%p218_p9), %v274_v5, %v273_v2  ;;  %v773_v9 = vpack.c.bf16 (!%p218_p9), %v276_v8, %v275_v7  ;;  %v277_v11 = vld [vmem:[%s1256_s1 + $0x30] sm:$0xff] (!%p218_p9)  ;;  %v278_v12 = vld [vmem:[%s1256_s1 + $0x38] sm:$0xff] (!%p218_p9)  ;;  %v279_v14 = vld [vmem:[%s1256_s1 + $0x40] sm:$0xff] (!%p218_p9)  ;;  %v928_v8 = vmov (!%p218_p9), 0.0   ;;  %vm531_vm3 = vcmask (!%p218_p9), 1041409   ;;  %s245_s17 = sand.u32 (!%p218_p9), 1, %s916_s22  }
  0x10   : > { %768 = vmatpush1.bf16.msra.mxu0 (!%p218_p9), %v767_v4  ;;  %v776_v13 = vpack.c.bf16 (!%p218_p9), %v278_v12, %v277_v11  ;;  %v280_v15 = vld [vmem:[%s1256_s1 + $0x48] sm:$0xff] (!%p218_p9)  ;;  %v281_v17 = vld [vmem:[%s1256_s1 + $0x50] sm:$0xff] (!%p218_p9)  ;;  %v282_v18 = vld [vmem:[%s1256_s1 + $0x58] sm:$0xff] (!%p218_p9)  ;;  %763 = vmatprep.mubr.msk.f32.mxu1 (!%p218_p9), %vm927_vm1, %v928_v8  ;;  %vm533_vm4 = vcmask (!%p218_p9), 1042434   ;;  %vm535_vm5 = vcmask (!%p218_p9), 1043459   ;;  %vm537_vm6 = vcmask (!%p218_p9), 1044484  }
  0x11   : > { %769 = vmatprep.subr.bf16.mxu0 (!%p218_p9), %v926_v3  ;;  %v779_v16 = vpack.c.bf16 (!%p218_p9), %v280_v15, %v279_v14  ;;  %v782_v19 = vpack.c.bf16 (!%p218_p9), %v282_v18, %v281_v17  ;;  %v283_v20 = vld [vmem:[%s1256_s1 + $0x60] sm:$0xff] (!%p218_p9)  ;;  %v284_v21 = vld [vmem:[%s1256_s1 + $0x68] sm:$0xff] (!%p218_p9)  ;;  %v285_v23 = vld [vmem:[%s1256_s1 + $0x70] sm:$0xff] (!%p218_p9)  ;;  %vm539_vm7 = vcmask (!%p218_p9), 1045509   ;;  %vm541_vm8 = vcmask (!%p218_p9), 1046534   ;;  %s694_s18 = sshll.u32 (!%p218_p9), %s245_s17, 3 }
  0x12   : > { %v785_v22 = vpack.c.bf16 (!%p218_p9), %v284_v21, %v283_v20  ;;  %v286_v24 = vld [vmem:[%s1256_s1 + $0x78] sm:$0xff] (!%p218_p9)  ;;  %v287_v26 = vld [vmem:[%s1256_s1 + $0x80] sm:$0xff] (!%p218_p9)  ;;  %v288_v27 = vld [vmem:[%s1256_s1 + $0x88] sm:$0xff] (!%p218_p9)  ;;  %vm543_vm9 = vcmask (!%p218_p9), 1047559   ;;  %s710_s20 = sshll.u32 (!%p218_p9), %s986_s25, 7  ;;  %s247_s26 = scalar_lea.vmem (!%p218_p9), [#allocation2], %s694_s18 }
  0x13   : > { %v788_v25 = vpack.c.bf16 (!%p218_p9), %v286_v24, %v285_v23  ;;  %v791_v28 = vpack.c.bf16 (!%p218_p9), %v288_v27, %v287_v26  ;;  %v289_v29 = vld [vmem:[%s1256_s1 + $0x90] sm:$0xff] (!%p218_p9)  ;;  %v290_v30 = vld [vmem:[%s1256_s1 + $0x98] sm:$0xff] (!%p218_p9)  ;;  %v500_v47 = vld [vmem:[%s1259_s4] sm:$0xff] (!%p218_p9)  ;;  %s1213_s11 = scalar_lea.hbm (!%p218_p9), %s1261_s6, %s710_s20  ;;  %s618_s12 = scalar_lea.sflag (!%p218_p9), [#allocation3], %s245_s17 }
  0x14   : > { %771 = vmatpush1.bf16.msra.mxu0 (!%p218_p9), %v770_v6  ;;  %v794_v31 = vpack.c.bf16 (!%p218_p9), %v290_v30, %v289_v29  ;;  %v501_v48 = vld [vmem:[%s1259_s4 + $0x8] sm:$0xff] (!%p218_p9)  ;;  %v502_v50 = vld [vmem:[%s1259_s4 + $0x10] sm:$0xff] (!%p218_p9)  ;;  %v503_v51 = vld [vmem:[%s1259_s4 + $0x18] sm:$0xff] (!%p218_p9)  ;;  %s929_s25 = smov (!%p218_p9), [#allocation2]  }
  0x15   : > { %s1271_s15 = smov (!%p249_p10, %s695_s15), 15  ;;  %772 = vmatprep.subr.bf16.mxu0 %v926_v3  ;;  %v797_v49 = vpack.c.bf16 %v501_v48, %v500_v47  ;;  %v800_v52 = vpack.c.bf16 %v503_v51, %v502_v50  ;;  %v504_v53 = vld [vmem:[%s1259_s4 + $0x20] sm:$0xff]  ;;  %v505_v54 = vld [vmem:[%s1259_s4 + $0x28] sm:$0xff]  ;;  %v506_v56 = vld [vmem:[%s1259_s4 + $0x30] sm:$0xff]  ;;  %s866_s14 = sshll.u32 %s929_s25, 4  ;;  %s867_s14 = int_to_ptr.vmem [resolvable:$false] %s866_s14 }
  0x16   : > { %s713_s28 = sshll.u32 %s1271_s15, 4  ;;  %v803_v55 = vpack.c.bf16 %v505_v54, %v504_v53  ;;  %v507_v57 = vld [vmem:[%s1259_s4 + $0x38] sm:$0xff]  ;;  %v508_v59 = vld [vmem:[%s1259_s4 + $0x40] sm:$0xff]  ;;  %v509_v60 = vld [vmem:[%s1259_s4 + $0x48] sm:$0xff]  ;;  %s868_s15 = scalar_lea.vmem %s867_s14, 256 }
  0x17   : > { %s1038_s10 = scalar_lea.vmem %s1255_s0, %s713_s28  ;;  %798 = vmatpush3.bf16.msra.mxu1 %v797_v49  ;;  %v806_v58 = vpack.c.bf16 %v507_v57, %v506_v56  ;;  %v809_v61 = vpack.c.bf16 %v509_v60, %v508_v59  ;;  %v510_v62 = vld [vmem:[%s1259_s4 + $0x50] sm:$0xff]  ;;  %v511_v63 = vld [vmem:[%s1259_s4 + $0x58] sm:$0xff]  ;;  %v512_v1 = vld [vmem:[%s1259_s4 + $0x60] sm:$0xff]  ;;  %s631_s28 = sshll.u32 %s247_s26, 4  ;;  %s1215_s28 = int_to_ptr.vmem [resolvable:$true] %s631_s28 }
  0x18   : > { %v256_v10 = vld [vmem:[%s1038_s10 + $0x8] sm:$0xff]  ;;  %774 = vmatpush1.bf16.msra.mxu0 %v773_v9  ;;  %v255_v32 = vld [vmem:[%s1038_s10] sm:$0xff]  ;;  %v258_v33 = vld [vmem:[%s1038_s10 + $0x18] sm:$0xff]  ;;  %799 = vmatprep.subr.bf16.mxu1 %v926_v3  ;;  %v812_v0 = vpack.c.bf16 %v511_v63, %v510_v62  ;;  %v436_v9 = vlaneseq  ;;  %s862_s13 = scalar_lea.vmem %s1215_s28, 128  ;;  %p869_p0 = scmp.lt.s32.totalorder %s1215_s28, %s867_s14 }
  0x19   : > { %699 = vmatprep.mubr.msk.f32.mxu0 %vm298_vm0, %v256_v10  ;;  %775 = vmatprep.subr.bf16.mxu0 %v926_v3  ;;  %v257_v34 = vld [vmem:[%s1038_s10 + $0x10] sm:$0xff]  ;;  %v260_v35 = vld [vmem:[%s1038_s10 + $0x28] sm:$0xff]  ;;  %v259_v36 = vld [vmem:[%s1038_s10 + $0x20] sm:$0xff]  ;;  %p863_p11 = scmp.ne.s32.totalorder %s1215_s28, %s862_s13  ;;  %p870_p1 = scmp.lt.s32.totalorder %s868_s15, %s862_s13 }
  0x1a   : > { %v262_v37 = vld [vmem:[%s1038_s10 + $0x38] sm:$0xff]  ;;  %v261_v38 = vld [vmem:[%s1038_s10 + $0x30] sm:$0xff]  ;;  %v264_v39 = vld [vmem:[%s1038_s10 + $0x48] sm:$0xff] }
  0x1b   : > { %v263_v40 = vld [vmem:[%s1038_s10 + $0x40] sm:$0xff]  ;;  %v266_v41 = vld [vmem:[%s1038_s10 + $0x58] sm:$0xff]  ;;  %v265_v42 = vld [vmem:[%s1038_s10 + $0x50] sm:$0xff]  ;;  %801 = vmatpush3.bf16.msra.mxu1 %v800_v52  ;;  %p864_p12 = pnand %p863_p11, %p1003_p5  ;;  %p871_p2 = por %p870_p1, %p869_p0 }
  0x1c   : > { %777 = vmatpush1.bf16.msra.mxu0 %v776_v13  ;;  %v268_v43 = vld [vmem:[%s1038_s10 + $0x68] sm:$0xff]  ;;  %v267_v44 = vld [vmem:[%s1038_s10 + $0x60] sm:$0xff]  ;;  %v270_v45 = vld [vmem:[%s1038_s10 + $0x78] sm:$0xff]  ;;  %802 = vmatprep.subr.bf16.mxu1 %v926_v3 }
  0x1d   : > { %778 = vmatprep.subr.bf16.mxu0 %v926_v3  ;;  %v269_v46 = vld [vmem:[%s1038_s10 + $0x70] sm:$0xff]  ;;  %v513_v2 = vld [vmem:[%s1259_s4 + $0x68] sm:$0xff]  ;;  %v515_v6 = vld [vmem:[%s1259_s4 + $0x78] sm:$0xff]  ;;  %p865_p13 = pneg %p864_p12 }
  0x1e   : > { %v815_v4 = vpack.c.bf16 %v513_v2, %v512_v1  ;;  %v514_v5 = vld [vmem:[%s1259_s4 + $0x70] sm:$0xff]  ;;  %v1172_v10 = vld [vmem:[%s1257_s2] ss:$0 sm:$0xff] }
  0x1f   : > { %804 = vmatpush3.bf16.msra.mxu1 %v803_v55  ;;  %v818_v7 = vpack.c.bf16 %v515_v6, %v514_v5  ;;  %v707_v11 = vld [vmem:[%s1258_s3] ss:$0 sm:$0xff]  ;;  %p872_p3 = pnand %p871_p2, %p865_p13 }
  0x20   : > { %780 = vmatpush1.bf16.msra.mxu0 %v779_v16  ;;  %805 = vmatprep.subr.bf16.mxu1 %v926_v3 }
  0x21   : > { %781 = vmatprep.subr.bf16.mxu0 %v926_v3 }
  0x23   : > { %807 = vmatpush3.bf16.msra.mxu1 %v806_v58 }
  0x24   : > { %783 = vmatpush1.bf16.msra.mxu0 %v782_v19  ;;  %808 = vmatprep.subr.bf16.mxu1 %v926_v3 }
  0x25   : > { %784 = vmatprep.subr.bf16.mxu0 %v926_v3 }
  0x27   : > { %810 = vmatpush3.bf16.msra.mxu1 %v809_v61 }
  0x28   : > { %786 = vmatpush1.bf16.msra.mxu0 %v785_v22  ;;  %811 = vmatprep.subr.bf16.mxu1 %v926_v3 }
  0x29   : > { %787 = vmatprep.subr.bf16.mxu0 %v926_v3 }
  0x2b   : > { %813 = vmatpush3.bf16.msra.mxu1 %v812_v0 }
  0x2c   : > { %789 = vmatpush1.bf16.msra.mxu0 %v788_v25  ;;  %814 = vmatprep.subr.bf16.mxu1 %v926_v3 }
  0x2d   : > { %790 = vmatprep.subr.bf16.mxu0 %v926_v3 }
  0x2f   : > { %816 = vmatpush3.bf16.msra.mxu1 %v815_v4 }
  0x30   : > { %792 = vmatpush1.bf16.msra.mxu0 %v791_v28  ;;  %817 = vmatprep.subr.bf16.mxu1 %v926_v3 }
  0x31   : > { %793 = vmatprep.subr.bf16.mxu0 %v926_v3  ;;  %v437_v3 = vshrl.u32 %v436_v9, 7 }
  0x33   : > { %819 = vmatpush3.bf16.msra.mxu1 %v818_v7  ;;  %vm1178_vm2 = vcmp.lt.s32.totalorder %v437_v3, %v707_v11 }
  0x34   : > { %795 = vmatpush1.bf16.msra.mxu0 %v794_v31 }
  0x37   : > { %388 = vmatmul.mubr.f32.vlgmr.msra.gmra.mrb[0].mxu0 %v255_v32 }
  0x38   : > { %700 = vmatprep.mubr.msk.f32.mxu0 %vm298_vm0, %v258_v33 }
  0x3b   : > { %393 = vmatmul.mubr.f32.gmra.mrb[2].mxu0 %v257_v34 }
  0x3c   : > { %701 = vmatprep.mubr.msk.f32.mxu0 %vm298_vm0, %v260_v35 }
  0x3f   : > { %398 = vmatmul.mubr.f32.gmra.mrb[4].mxu0 %v259_v36 }
  0x40   : > { %702 = vmatprep.mubr.msk.f32.mxu0 %vm298_vm0, %v262_v37 }
  0x43   : > { %403 = vmatmul.mubr.f32.gmra.mrb[6].mxu0 %v261_v38 }
  0x44   : > { %703 = vmatprep.mubr.msk.f32.mxu0 %vm298_vm0, %v264_v39 }
  0x47   : > { %408 = vmatmul.mubr.f32.gmra.mrb[8].mxu0 %v263_v40 }
  0x48   : > { %704 = vmatprep.mubr.msk.f32.mxu0 %vm298_vm0, %v266_v41 }
  0x4b   : > { %413 = vmatmul.mubr.f32.gmra.mrb[10].mxu0 %v265_v42 }
  0x4c   : > { %705 = vmatprep.mubr.msk.f32.mxu0 %vm298_vm0, %v268_v43 }
  0x4f   : > { %418 = vmatmul.mubr.f32.gmra.mrb[12].mxu0 %v267_v44 }
  0x50   : > { %706 = vmatprep.mubr.msk.f32.mxu0 %vm298_vm0, %v270_v45 }
  0x53   : > { %423 = vmatmul.mubr.f32.gmra.mrb[14].mxu0 %v269_v46 }
 0x10a   : > { %v389_v12 = vpop.f32.mrb[0].mxu0 }
 0x10b   : > { %v390_v13 = vadd.f32 %v1172_v10, %v389_v12  ;;  %v391_v14 = vpop.f32.mrb[1].mxu0 }
 0x10d   : > { %v428_v16 = vmax.f32 %v390_v13, 0.0 }
 0x10e   : > { %v394_v17 = vpop.f32.mrb[2].mxu0 }
 0x10f   : > { %v444_v18 = vsel %vm1178_vm2, %v428_v16, 0.0  ;;  %v395_v19 = vadd.f32 %v1172_v10, %v394_v17  ;;  %v396_v20 = vpop.f32.mrb[3].mxu0 }
 0x110   : > { %v452_v21 = vrot.slane %v444_v18, 4 }
 0x111   : > { %v429_v22 = vmax.f32 %v395_v19, 0.0 }
 0x112   : > { %v453_v23 = vmax.f32 %v444_v18, %v452_v21  ;;  %v399_v24 = vpop.f32.mrb[4].mxu0 }
 0x113   : > { %v445_v25 = vsel %vm1178_vm2, %v429_v22, 0.0  ;;  %v400_v26 = vadd.f32 %v1172_v10, %v399_v24  ;;  %v401_v27 = vpop.f32.mrb[5].mxu0 }
 0x114   : > { %v454_v28 = vrot.slane %v453_v23, 2  ;;  %v458_v29 = vrot.slane %v445_v25, 4 }
 0x115   : > { %v430_v30 = vmax.f32 %v400_v26, 0.0 }
 0x116   : > { %v455_v31 = vmax.f32 %v453_v23, %v454_v28  ;;  %v459_v32 = vmax.f32 %v445_v25, %v458_v29  ;;  %v404_v33 = vpop.f32.mrb[6].mxu0 }
 0x117   : > { %v446_v34 = vsel %vm1178_vm2, %v430_v30, 0.0  ;;  %v405_v35 = vadd.f32 %v1172_v10, %v404_v33  ;;  %v406_v36 = vpop.f32.mrb[7].mxu0 }
 0x118   : > { %v460_v37 = vrot.slane %v459_v32, 2  ;;  %v464_v38 = vrot.slane %v446_v34, 4  ;;  %v456_v40 = vrot.slane %v455_v31, 1 }
 0x119   : > { %v431_v39 = vmax.f32 %v405_v35, 0.0 }
 0x11a   : > { %v461_v41 = vmax.f32 %v459_v32, %v460_v37  ;;  %v465_v42 = vmax.f32 %v446_v34, %v464_v38  ;;  %v409_v43 = vpop.f32.mrb[8].mxu0  ;;  %v457_v51 = vmax.f32 %v455_v31, %v456_v40 }
 0x11b   : > { %v447_v44 = vsel %vm1178_vm2, %v431_v39, 0.0  ;;  %v410_v45 = vadd.f32 %v1172_v10, %v409_v43  ;;  %v411_v46 = vpop.f32.mrb[9].mxu0 }
 0x11c   : > { %v462_v47 = vrot.slane %v461_v41, 1  ;;  %v466_v48 = vrot.slane %v465_v42, 2  ;;  %v470_v49 = vrot.slane %v447_v44, 4 }
 0x11d   : > { %v432_v50 = vmax.f32 %v410_v45, 0.0 }
 0x11e   : > { %v463_v52 = vmax.f32 %v461_v41, %v462_v47  ;;  %v467_v53 = vmax.f32 %v465_v42, %v466_v48  ;;  %v471_v54 = vmax.f32 %v447_v44, %v470_v49  ;;  %v414_v55 = vpop.f32.mrb[10].mxu0  ;;  %v708_v44 = vld [vmem:[%s1260_s5] ss:$0 sm:$0xff] }
 0x11f   : > { %v448_v56 = vsel %vm1178_vm2, %v432_v50, 0.0  ;;  %v415_v57 = vadd.f32 %v1172_v10, %v414_v55  ;;  %v416_v58 = vpop.f32.mrb[11].mxu0 }
 0x120   : > { %v532_v59 = vsel %vm531_vm3, %v463_v52, %v457_v51  ;;  %v468_v60 = vrot.slane %v467_v53, 1  ;;  %v472_v61 = vrot.slane %v471_v54, 2  ;;  %v476_v62 = vrot.slane %v448_v56, 4 }
 0x121   : > { %v433_v63 = vmax.f32 %v415_v57, 0.0 }
 0x122   : > { %v469_v0 = vmax.f32 %v467_v53, %v468_v60  ;;  %v473_v1 = vmax.f32 %v471_v54, %v472_v61  ;;  %v477_v2 = vmax.f32 %v448_v56, %v476_v62  ;;  %v419_v4 = vpop.f32.mrb[12].mxu0 }
 0x123   : > { %v449_v5 = vsel %vm1178_vm2, %v433_v63, 0.0  ;;  %v420_v6 = vadd.f32 %v1172_v10, %v419_v4  ;;  %v421_v7 = vpop.f32.mrb[13].mxu0 }
 0x124   : > { %v534_v8 = vsel %vm533_vm4, %v469_v0, %v532_v59  ;;  %v474_v9 = vrot.slane %v473_v1, 1  ;;  %v478_v3 = vrot.slane %v477_v2, 2  ;;  %v482_v11 = vrot.slane %v449_v5, 4 }
 0x125   : > { %v434_v12 = vmax.f32 %v420_v6, 0.0 }
 0x126   : > { %v475_v13 = vmax.f32 %v473_v1, %v474_v9  ;;  %v479_v14 = vmax.f32 %v477_v2, %v478_v3  ;;  %v483_v16 = vmax.f32 %v449_v5, %v482_v11  ;;  %v424_v17 = vpop.f32.mrb[14].mxu0 }
 0x127   : > { %v450_v18 = vsel %vm1178_vm2, %v434_v12, 0.0  ;;  %v425_v19 = vadd.f32 %v1172_v10, %v424_v17  ;;  %v426_v20 = vpop.f32.mrb[15].mxu0 }
 0x128   : > { %v480_v21 = vrot.slane %v479_v14, 1  ;;  %v484_v22 = vrot.slane %v483_v16, 2  ;;  %v488_v23 = vrot.slane %v450_v18, 4  ;;  %v536_v24 = vsel %vm535_vm5, %v475_v13, %v534_v8 }
 0x129   : > { %v435_v25 = vmax.f32 %v425_v19, 0.0 }
 0x12a   : > { %v481_v26 = vmax.f32 %v479_v14, %v480_v21  ;;  %v485_v27 = vmax.f32 %v483_v16, %v484_v22  ;;  %v489_v28 = vmax.f32 %v450_v18, %v488_v23 }
 0x12b   : > { %v451_v29 = vsel %vm1178_vm2, %v435_v25, 0.0 }
 0x12c   : > { %v486_v30 = vrot.slane %v485_v27, 1  ;;  %v490_v31 = vrot.slane %v489_v28, 2  ;;  %v494_v32 = vrot.slane %v451_v29, 4  ;;  %v538_v33 = vsel %vm537_vm6, %v481_v26, %v536_v24 }
 0x12e   : > { %v487_v10 = vmax.f32 %v485_v27, %v486_v30  ;;  %v491_v34 = vmax.f32 %v489_v28, %v490_v31  ;;  %v495_v35 = vmax.f32 %v451_v29, %v494_v32 }
 0x130   : > { %v492_v36 = vrot.slane %v491_v34, 1  ;;  %v496_v37 = vrot.slane %v495_v35, 2  ;;  %v540_v38 = vsel %vm539_vm7, %v487_v10, %v538_v33 }
 0x132   : > { %v493_v39 = vmax.f32 %v491_v34, %v492_v36  ;;  %v497_v40 = vmax.f32 %v495_v35, %v496_v37 }
 0x134   : > { %v498_v41 = vrot.slane %v497_v40, 1  ;;  %v542_v42 = vsel %vm541_vm8, %v493_v39, %v540_v38 }
 0x136   : > { %v499_v15 = vmax.f32 %v497_v40, %v498_v41 }
 0x138   : > { %v544_v43 = vsel %vm543_vm9, %v499_v15, %v542_v42 }
 0x139   : > { %764 = vmatmul.mubr.f32.vlgmr.msra.gmra.mrb[0].mxu1 %v544_v43 }
 0x20c   : > { %v612_v45 = vpop.f32.mrb[0].mxu1 }
 0x20d   : > { %v613_v46 = vadd.f32 %v708_v44, %v612_v45  ;;  %v765_v47 = vpop.f32.mrb[1].mxu1 }
 0x20f   : > { %616 = vst [vmem:[%s247_s26] sm:$0xff] %v613_v46 }
 0x210   : > { %875 = shalt.err (!%p872_p3)
}
 0x211   : > { %s876_s16 = scalar_lea.hbm %s1213_s11, 128  ;;  %s880_s10 = scalar_lea.hbm %s1261_s6, 256 }
 0x212   : > { %p877_p4 = scmp.ne.s32.totalorder %s1213_s11, %s876_s16  ;;  %p881_p9 = scmp.lt.u32.totalorder %s1213_s11, %s1261_s6 }
 0x213   : > { %p882_p10 = scmp.lt.u32.totalorder %s880_s10, %s876_s16  ;;  %p884_p12 = scmp.lt.u32.totalorder %s876_s16, %s1213_s11 }
 0x214   : > { %p878_p7 = pnand %p877_p4, %p1003_p5 }
 0x215   : > { %p883_p11 = por %p882_p10, %p881_p9 }
 0x216   : > { %p879_p8 = pneg %p878_p7 }
 0x217   : > { %p885_p13 = por %p884_p12, %p883_p11 }
 0x219   : > { %p886_p0 = pnand %p885_p13, %p879_p8 }
 0x21b   : > { %889 = shalt.err (!%p886_p0)
}
 0x21c   : > { %820 = dma.vmem_to_hbm [thread:$0]  (%p1003_p5), %s1215_s28, 128, %s1213_s11, %s618_s12  }
 0x21d PF: > { %p826_p1 = scmp.ge.s32.totalorder %s924_s24, 2  ;;  %s643_s26 = sand.u32 1, %s912_s21  }
 0x21e   : > { %s644_s29 = scalar_lea.sflag [#allocation3], %s643_s26 }
 0x21f   : > { %p823_p2 = pnand %p826_p1, %p1007_p6 }
 0x221   : > { %907 = dma.done.wait (!%p823_p2), %s644_s29, 128  }
 0x222   : > { %909 = vsyncadd (!%p823_p2), %s644_s29, 4294967168  ;;  %p16_p3 = scmp.ge.s32.totalorder %s990_s27, 4   ;;  %s1266_s21 = smov %s916_s22 }
 0x223   : > { %s1267_s22 = smov %s920_s23  ;;  %s1268_s23 = smov %s1001_s30 }
 0x224   : > { %s1269_s24 = smov %s990_s27  ;;  %18 = sbr.rel (!%p16_p3) target bundleno = 3 (0x3), region = 79 }
 0x22b   :  { %649 = vsyncpa [#allocation3], 1 }
 0x22c   :  { %651 = vsyncpa [#allocation3 + $0x1], 1 }

</bundles_post_ra>
